<compile_context>
chip_gen: v5e
topology: v5e:2x2
jax: 0.10.0
libtpu: 0.0.40
codegen_flags: <defaults>
</compile_context>

<pallas_src>
import functools

import jax
import jax.numpy as jnp
import numpy as np
from jax.experimental import pallas as pl
from jax.experimental.pallas import tpu as pltpu

# ----------------------------- model config ---------------------------------
ENC_DIM = 32
ACTION_DIM = 8
HIDDEN_DIM = 32
FEATURE_DIM = 24
N_LAYERS = 4          # hidden layers per Q net (PyTorch default n_layers=4)
LN_EPS = 1e-5

FUSED = 2 * HIDDEN_DIM            # 64 lanes: [q1 half | q2 half]
LANES = 128                       # w_slab / v_slab lane width
IN_DIM = ENC_DIM + ACTION_DIM     # 40: kernel input is [enc | act]

# weight-slab row offsets (all multiples of 8 -> static 8x128-tile-aligned views)
ROW_IN = 0                                  # [40,128]: trunk_w (lanes 0..23), w0a (lanes 64..127)
ROW_W0E = ROW_IN + IN_DIM                   # 40 : Q layer-0 feature rows [24, 64]
ROW_H1 = ROW_W0E + FEATURE_DIM              # 64 : block-diag hidden layers 1..3
ROW_M = ROW_H1 + (N_LAYERS - 1) * FUSED     # 256: block-diag 1/H LayerNorm stats matrix
ROW_WF = ROW_M + FUSED                      # 320: block-diag final [64, 2]
N_W_ROWS = ROW_WF + FUSED                   # 384

# vector-slab rows
V_B0 = 0        # lanes 0..23: trunk bias ; lanes 64..127: fused Q layer-0 bias
V_TG = 1        # trunk LN gamma  (lanes 0..23)
V_TBETA = 2     # trunk LN beta   (lanes 0..23)
V_Q0G = 3       # Q layer-0 gamma (lanes 0..63)
V_Q0B = 4       # Q layer-0 beta  (lanes 0..63)
V_H = 5         # layers 1..3: (bias, gamma, beta) triplets -> rows 5..13
V_FINAL = V_H + 3 * (N_LAYERS - 1)          # 14: final bias (lanes 0..1)
N_V_ROWS = 16


# ----------------------------- kernel ----------------------------------------
def critic_kernel(x_ref, w_ref, v_ref, out_ref):
    B = x_ref.shape[0]
    F, W = FEATURE_DIM, FUSED

    xin = x_ref[...]                          # [B, 40] = [enc | act]
    vecs = v_ref[...]                         # [16, 128]

    # ---- fused (trunk | Q-layer-0 action part) matmul: one MXU push --------
    y0 = jnp.dot(xin, w_ref[ROW_IN:ROW_IN + IN_DIM, :],
                 preferred_element_type=jnp.float32) + vecs[V_B0:V_B0 + 1, :]   # [B, 128]

    # ---- trunk LayerNorm + SiLU on lanes 0..F-1 -----------------------------
    t = y0[:, 0:F]
    s = jnp.sum(t, axis=-1, keepdims=True)
    sq = jnp.sum(t * t, axis=-1, keepdims=True)
    mu = s * (1.0 / F)
    var = sq * (1.0 / F) - mu * mu
    yt = (t - mu) * jax.lax.rsqrt(var + LN_EPS) * vecs[V_TG:V_TG + 1, 0:F] \
         + vecs[V_TBETA:V_TBETA + 1, 0:F]
    feat = yt * jax.nn.sigmoid(yt)            # [B, F]

    # ---- per-half LayerNorm + SiLU with MXU-based statistics ---------------
    m_stat = w_ref[ROW_M:ROW_M + W, 0:W]      # block-diag 1/H, loaded once

    def ln_silu_halves(x, g, b):
        mu = jnp.dot(x, m_stat, preferred_element_type=jnp.float32)       # per-half mean, pre-broadcast
        m2 = jnp.dot(x * x, m_stat, preferred_element_type=jnp.float32)   # per-half E[x^2]
        var = m2 - mu * mu
        y = (x - mu) * jax.lax.rsqrt(var + LN_EPS) * g + b
        return y * jax.nn.sigmoid(y)

    # ---- fused twin-Q layer 0: feat part + (action part + bias from y0) ----
    h = jnp.dot(feat, w_ref[ROW_W0E:ROW_W0E + F, 0:W],
                preferred_element_type=jnp.float32) + y0[:, W:2 * W]
    h = ln_silu_halves(h, vecs[V_Q0G:V_Q0G + 1, 0:W], vecs[V_Q0B:V_Q0B + 1, 0:W])

    # ---- hidden layers 1..N_LAYERS-1: block-diagonal [64, 64] matmuls ------
    for l in range(1, N_LAYERS):
        r = ROW_H1 + (l - 1) * W
        vr = V_H + 3 * (l - 1)
        h = jnp.dot(h, w_ref[r:r + W, 0:W],
                    preferred_element_type=jnp.float32) + vecs[vr:vr + 1, 0:W]
        h = ln_silu_halves(h, vecs[vr + 1:vr + 2, 0:W], vecs[vr + 2:vr + 3, 0:W])

    # ---- final block-diagonal [64, 2] layer -> merged (q1 | q2) ------------
    out_ref[...] = (jnp.dot(h, w_ref[ROW_WF:ROW_WF + W, 0:2],
                            preferred_element_type=jnp.float32)
                    + vecs[V_FINAL:V_FINAL + 1, 0:2])


# ----------------------------- parameter init --------------------------------
def _linear_params(key, in_dim, out_dim):
    kw, kb = jax.random.split(key)
    scale = 1.0 / np.sqrt(in_dim)
    w = jax.random.uniform(kw, (in_dim, out_dim), jnp.float32, -scale, scale)
    b = jax.random.uniform(kb, (out_dim,), jnp.float32, -scale, scale)
    return w, b


def init_critic_params(key):
    """Per-layer parameters with shapes matching the PyTorch module (W stored [in, out])."""
    # TODO(synk): utils.weight_init (orthogonal init) not replicated; PyTorch Linear default
    # init is used instead — forward-pass semantics are unaffected.
    keys = iter(jax.random.split(key, 16))
    ones_h = jnp.ones((HIDDEN_DIM,), jnp.float32)
    zeros_h = jnp.zeros((HIDDEN_DIM,), jnp.float32)

    p = {}
    p['trunk_w'], p['trunk_b'] = _linear_params(next(keys), ENC_DIM, FEATURE_DIM)
    p['trunk_g'] = jnp.ones((FEATURE_DIM,), jnp.float32)
    p['trunk_beta'] = jnp.zeros((FEATURE_DIM,), jnp.float32)

    for name in ('q1', 'q2'):
        net = []
        w0, b0 = _linear_params(next(keys), FEATURE_DIM + ACTION_DIM, HIDDEN_DIM)
        net.append((w0, b0, ones_h, zeros_h))
        for _ in range(N_LAYERS - 1):
            w, b = _linear_params(next(keys), HIDDEN_DIM, HIDDEN_DIM)
            net.append((w, b, ones_h, zeros_h))
        wf, bf = _linear_params(next(keys), HIDDEN_DIM, 1)
        net.append((wf, bf))
        p[name] = net
    return p


def pack_critic_params(p):
    """Pack all parameters (plus the LayerNorm stats matrix) into two slabs."""
    F, A, H, W = FEATURE_DIM, ACTION_DIM, HIDDEN_DIM, FUSED
    w_slab = np.zeros((N_W_ROWS, LANES), np.float32)
    v_slab = np.zeros((N_V_ROWS, LANES), np.float32)

    # trunk goes into the fused input block, lanes 0..F-1 (enc rows only)
    w_slab[0:ENC_DIM, 0:F] = np.asarray(p['trunk_w'])
    v_slab[V_B0, 0:F] = np.asarray(p['trunk_b'])
    v_slab[V_TG, 0:F] = np.asarray(p['trunk_g'])
    v_slab[V_TBETA, 0:F] = np.asarray(p['trunk_beta'])

    # block-diagonal 1/H matrix for per-half LayerNorm statistics (MXU path)
    m = np.zeros((W, W), np.float32)
    m[:H, :H] = 1.0 / H
    m[H:, H:] = 1.0 / H
    w_slab[ROW_M:ROW_M + W, 0:W] = m

    for qi, net in enumerate((p['q1'], p['q2'])):
        lo, hi = qi * H, (qi + 1) * H
        w0, b0, g0, bb0 = net[0]
        w0 = np.asarray(w0)
        # layer 0 split: feature rows -> ROW_W0E block (lanes 0..63),
        #                action rows  -> fused input block, lanes 64..127
        w_slab[ROW_W0E:ROW_W0E + F, lo:hi] = w0[:F]
        w_slab[ENC_DIM:ENC_DIM + A, W + lo:W + hi] = w0[F:]
        v_slab[V_B0, W + lo:W + hi] = np.asarray(b0)
        v_slab[V_Q0G, lo:hi] = np.asarray(g0)
        v_slab[V_Q0B, lo:hi] = np.asarray(bb0)
        # hidden layers: block-diagonal fused [64, 64] weights
        for l in range(1, N_LAYERS):
            w, b, g, bb = net[l]
            r = ROW_H1 + (l - 1) * W
            w_slab[r + lo:r + hi, lo:hi] = np.asarray(w)
            vr = V_H + 3 * (l - 1)
            v_slab[vr, lo:hi] = np.asarray(b)
            v_slab[vr + 1, lo:hi] = np.asarray(g)
            v_slab[vr + 2, lo:hi] = np.asarray(bb)
        # final layer: block-diagonal [64, 2]
        wf, bf = net[N_LAYERS]
        w_slab[ROW_WF + lo:ROW_WF + hi, qi] = np.asarray(wf)[:, 0]
        v_slab[V_FINAL, qi] = np.asarray(bf)[0]

    return jnp.asarray(w_slab), jnp.asarray(v_slab)


# ----------------------------- wrapper ----------------------------------------
def _cost_estimate(b):
    macs_per_row = (IN_DIM * LANES + FEATURE_DIM * FUSED
                    + (N_LAYERS - 1) * FUSED * FUSED + FUSED * 2
                    + 2 * N_LAYERS * FUSED * FUSED)          # incl. LN-stat matmuls
    flops = 2 * b * macs_per_row + 12 * b * (FEATURE_DIM + N_LAYERS * FUSED)
    trans = 2 * b * (FEATURE_DIM + N_LAYERS * FUSED)          # sigmoid + rsqrt
    bytes_acc = 4 * (b * IN_DIM + b * 2 + N_W_ROWS * LANES + N_V_ROWS * LANES)
    return pl.CostEstimate(flops=int(flops), transcendentals=int(trans),
                           bytes_accessed=int(bytes_acc))


def _critic_call(xin, w_slab, v_slab, block_b):
    b = xin.shape[0]
    out_shape = jax.ShapeDtypeStruct((b, 2), jnp.float32)
    if block_b is None or b <= block_b:
        # small batch: grid-less single invocation (a serial grid is pure overhead here)
        vmem = pl.BlockSpec(memory_space=pltpu.MemorySpace.VMEM)
        return pl.pallas_call(
            critic_kernel,
            out_shape=out_shape,
            in_specs=[vmem, vmem, vmem],
            out_specs=vmem,
            cost_estimate=_cost_estimate(b),
        )(xin, w_slab, v_slab)

    # large batch: 1-D batch grid; parameter slabs DMA'd once (index_map -> (0, 0))
    # and VMEM-resident across steps; batch axis "parallel" for v7x's 2 TensorCores.
    assert b % block_b == 0
    return pl.pallas_call(
        critic_kernel,
        out_shape=out_shape,
        grid=(b // block_b,),
        in_specs=[
            pl.BlockSpec((block_b, IN_DIM), lambda i: (i, 0)),
            pl.BlockSpec((N_W_ROWS, LANES), lambda i: (0, 0)),
            pl.BlockSpec((N_V_ROWS, LANES), lambda i: (0, 0)),
        ],
        out_specs=pl.BlockSpec((block_b, 2), lambda i: (i, 0)),
        compiler_params=pltpu.CompilerParams(dimension_semantics=("parallel",)),
        cost_estimate=_cost_estimate(b),
    )(xin, w_slab, v_slab)


@functools.partial(jax.jit, static_argnames=("block_b",))
def critic_forward(enc, action, w_slab, v_slab, block_b=256):
    """Returns merged q12 of shape (B, 2): column 0 = q1, column 1 = q2."""
    b = enc.shape[0]
    xin = jnp.concatenate([enc, action], axis=-1)          # concat folded into layer-0 matmul
    if block_b is not None and b > block_b:
        pad = (-b) % block_b
        if pad:
            xin = jnp.pad(xin, ((0, pad), (0, 0)))
        return _critic_call(xin, w_slab, v_slab, block_b)[:b]
    return _critic_call(xin, w_slab, v_slab, None)


# ----------------------------- pure-JAX reference -----------------------------
def _ref_forward(enc, action, p):
    def ln(x, g, b):
        mu = x.mean(-1, keepdims=True)
        var = ((x - mu) ** 2).mean(-1, keepdims=True)
        return (x - mu) / jnp.sqrt(var + LN_EPS) * g + b

    def silu(x):
        return x * jax.nn.sigmoid(x)

    feat = silu(ln(enc @ p['trunk_w'] + p['trunk_b'], p['trunk_g'], p['trunk_beta']))
    x = jnp.concatenate([feat, action], axis=-1)

    def qnet(net):
        h = x
        for (w, b, g, bb) in net[:N_LAYERS]:
            h = silu(ln(h @ w + b, g, bb))
        wf, bf = net[N_LAYERS]
        return h @ wf + bf

    return qnet(p['q1']), qnet(p['q2'])


# ----------------------------- main -------------------------------------------
if __name__ == "__main__":
    key = jax.random.PRNGKey(0)
    k1, k2, k3, k4, k5 = jax.random.split(key, 5)

    params = init_critic_params(k3)
    w_slab, v_slab = pack_critic_params(params)

    # --- small batch: latency path (grid-less) ---
    enc_s = jax.random.normal(k1, (8, ENC_DIM), jnp.float32)
    act_s = jax.random.normal(k2, (8, ACTION_DIM), jnp.float32)
    q12_s = critic_forward(enc_s, act_s, w_slab, v_slab)
    jax.block_until_ready(q12_s)
    q1_ref, q2_ref = _ref_forward(enc_s, act_s, params)
    np.testing.assert_allclose(np.asarray(q12_s[:, 0:1]), np.asarray(q1_ref), rtol=5e-4, atol=5e-5)
    np.testing.assert_allclose(np.asarray(q12_s[:, 1:2]), np.asarray(q2_ref), rtol=5e-4, atol=5e-5)

    # --- larger batch: throughput path (1-D batch grid, VMEM-resident slabs) ---
    enc_l = jax.random.normal(k4, (512, ENC_DIM), jnp.float32)
    act_l = jax.random.normal(k5, (512, ACTION_DIM), jnp.float32)
    q12_l = critic_forward(enc_l, act_l, w_slab, v_slab)
    jax.block_until_ready(q12_l)
    q1_ref, q2_ref = _ref_forward(enc_l, act_l, params)
    np.testing.assert_allclose(np.asarray(q12_l[:, 0:1]), np.asarray(q1_ref), rtol=5e-4, atol=5e-5)
    np.testing.assert_allclose(np.asarray(q12_l[:, 1:2]), np.asarray(q2_ref), rtol=5e-4, atol=5e-5)

    print("KERNEL_OK")
</pallas_src>

<mosaic_0001>
module attributes {stable_mosaic.version = 11 : i64} {
  func.func @critic_kernel(%arg0: memref<8x40xf32, #tpu.memory_space<vmem>>, %arg1: memref<384x128xf32, #tpu.memory_space<vmem>>, %arg2: memref<16x128xf32, #tpu.memory_space<vmem>>, %arg3: memref<8x2xf32, #tpu.memory_space<vmem>>) attributes {dimension_semantics = [], scalar_prefetch = 0 : i64, scratch_operands = 0 : i64, tpu.core_type = #tpu.core_type<tc>} {
    %c0 = arith.constant 0 : index
    %c0_0 = arith.constant 0 : index
    %0 = vector.load %arg0[%c0, %c0_0] : memref<8x40xf32, #tpu.memory_space<vmem>>, vector<8x40xf32>
    %c0_1 = arith.constant 0 : index
    %c0_2 = arith.constant 0 : index
    %1 = vector.load %arg2[%c0_1, %c0_2] : memref<16x128xf32, #tpu.memory_space<vmem>>, vector<16x128xf32>
    %c0_3 = arith.constant 0 : index
    %c0_4 = arith.constant 0 : index
    %2 = vector.load %arg1[%c0_3, %c0_4] : memref<384x128xf32, #tpu.memory_space<vmem>>, vector<40x128xf32>
    %cst = arith.constant dense<0.000000e+00> : vector<8x128xf32>
    %3 = tpu.matmul %0, %2, %cst {dimension_numbers = #tpu.dot_dimension_numbers<[1], [0], [0], [1], [0, 0, 1, 1], [], []>} : vector<8x40xf32>, vector<40x128xf32>, vector<8x128xf32> -> vector<8x128xf32>
    %4 = vector.extract_strided_slice %1 {offsets = [0, 0], sizes = [1, 128], strides = [1, 1]} : vector<16x128xf32> to vector<1x128xf32>
    %5 = vector.broadcast %4 : vector<1x128xf32> to vector<8x128xf32>
    %6 = arith.addf %3, %5 : vector<8x128xf32>
    %7 = vector.extract_strided_slice %6 {offsets = [0, 0], sizes = [8, 24], strides = [1, 1]} : vector<8x128xf32> to vector<8x24xf32>
    %cst_5 = arith.constant dense<0.000000e+00> : vector<8xf32>
    %8 = vector.multi_reduction <add>, %7, %cst_5 [1] : vector<8x24xf32> to vector<8xf32>
    %9 = vector.shape_cast %8 : vector<8xf32> to vector<8x1xf32>
    %10 = arith.mulf %7, %7 : vector<8x24xf32>
    %cst_6 = arith.constant dense<0.000000e+00> : vector<8xf32>
    %11 = vector.multi_reduction <add>, %10, %cst_6 [1] : vector<8x24xf32> to vector<8xf32>
    %12 = vector.shape_cast %11 : vector<8xf32> to vector<8x1xf32>
    %cst_7 = arith.constant 0.0416666679 : f32
    %13 = vector.broadcast %cst_7 : f32 to vector<8x1xf32>
    %14 = arith.mulf %9, %13 : vector<8x1xf32>
    %cst_8 = arith.constant 0.0416666679 : f32
    %15 = vector.broadcast %cst_8 : f32 to vector<8x1xf32>
    %16 = arith.mulf %12, %15 : vector<8x1xf32>
    %17 = arith.mulf %14, %14 : vector<8x1xf32>
    %18 = arith.subf %16, %17 : vector<8x1xf32>
    %19 = vector.broadcast %14 : vector<8x1xf32> to vector<8x24xf32>
    %20 = arith.subf %7, %19 : vector<8x24xf32>
    %cst_9 = arith.constant 9.99999974E-6 : f32
    %21 = vector.broadcast %cst_9 : f32 to vector<8x1xf32>
    %22 = arith.addf %18, %21 : vector<8x1xf32>
    %23 = math.rsqrt %22 : vector<8x1xf32>
    %24 = vector.broadcast %23 : vector<8x1xf32> to vector<8x24xf32>
    %25 = arith.mulf %20, %24 : vector<8x24xf32>
    %26 = vector.extract_strided_slice %1 {offsets = [1, 0], sizes = [1, 24], strides = [1, 1]} : vector<16x128xf32> to vector<1x24xf32>
    %27 = vector.broadcast %26 : vector<1x24xf32> to vector<8x24xf32>
    %28 = arith.mulf %25, %27 : vector<8x24xf32>
    %29 = vector.extract_strided_slice %1 {offsets = [2, 0], sizes = [1, 24], strides = [1, 1]} : vector<16x128xf32> to vector<1x24xf32>
    %30 = vector.broadcast %29 : vector<1x24xf32> to vector<8x24xf32>
    %31 = arith.addf %28, %30 : vector<8x24xf32>
    %32 = arith.negf %31 : vector<8x24xf32>
    %33 = math.exp %32 : vector<8x24xf32>
    %cst_10 = arith.constant 1.000000e+00 : f32
    %34 = vector.broadcast %cst_10 : f32 to vector<8x24xf32>
    %35 = arith.addf %34, %33 : vector<8x24xf32>
    %36 = arith.divf %34, %35 : vector<8x24xf32>
    %37 = arith.mulf %31, %36 : vector<8x24xf32>
    %c256 = arith.constant 256 : index
    %c0_11 = arith.constant 0 : index
    %38 = vector.load %arg1[%c256, %c0_11] : memref<384x128xf32, #tpu.memory_space<vmem>>, vector<64x64xf32>
    %c40 = arith.constant 40 : index
    %c0_12 = arith.constant 0 : index
    %39 = vector.load %arg1[%c40, %c0_12] : memref<384x128xf32, #tpu.memory_space<vmem>>, vector<24x64xf32>
    %cst_13 = arith.constant dense<0.000000e+00> : vector<8x64xf32>
    %40 = tpu.matmul %37, %39, %cst_13 {dimension_numbers = #tpu.dot_dimension_numbers<[1], [0], [0], [1], [0, 0, 1, 1], [], []>} : vector<8x24xf32>, vector<24x64xf32>, vector<8x64xf32> -> vector<8x64xf32>
    %41 = vector.extract_strided_slice %6 {offsets = [0, 64], sizes = [8, 64], strides = [1, 1]} : vector<8x128xf32> to vector<8x64xf32>
    %42 = arith.addf %40, %41 : vector<8x64xf32>
    %43 = vector.extract_strided_slice %1 {offsets = [3, 0], sizes = [1, 64], strides = [1, 1]} : vector<16x128xf32> to vector<1x64xf32>
    %44 = vector.extract_strided_slice %1 {offsets = [4, 0], sizes = [1, 64], strides = [1, 1]} : vector<16x128xf32> to vector<1x64xf32>
    %cst_14 = arith.constant dense<0.000000e+00> : vector<8x64xf32>
    %45 = tpu.matmul %42, %38, %cst_14 {dimension_numbers = #tpu.dot_dimension_numbers<[1], [0], [0], [1], [0, 0, 1, 1], [], []>} : vector<8x64xf32>, vector<64x64xf32>, vector<8x64xf32> -> vector<8x64xf32>
    %46 = arith.mulf %42, %42 : vector<8x64xf32>
    %cst_15 = arith.constant dense<0.000000e+00> : vector<8x64xf32>
    %47 = tpu.matmul %46, %38, %cst_15 {dimension_numbers = #tpu.dot_dimension_numbers<[1], [0], [0], [1], [0, 0, 1, 1], [], []>} : vector<8x64xf32>, vector<64x64xf32>, vector<8x64xf32> -> vector<8x64xf32>
    %48 = arith.mulf %45, %45 : vector<8x64xf32>
    %49 = arith.subf %47, %48 : vector<8x64xf32>
    %50 = arith.subf %42, %45 : vector<8x64xf32>
    %cst_16 = arith.constant 9.99999974E-6 : f32
    %51 = vector.broadcast %cst_16 : f32 to vector<8x64xf32>
    %52 = arith.addf %49, %51 : vector<8x64xf32>
    %53 = math.rsqrt %52 : vector<8x64xf32>
    %54 = arith.mulf %50, %53 : vector<8x64xf32>
    %55 = vector.broadcast %43 : vector<1x64xf32> to vector<8x64xf32>
    %56 = arith.mulf %54, %55 : vector<8x64xf32>
    %57 = vector.broadcast %44 : vector<1x64xf32> to vector<8x64xf32>
    %58 = arith.addf %56, %57 : vector<8x64xf32>
    %59 = arith.negf %58 : vector<8x64xf32>
    %60 = math.exp %59 : vector<8x64xf32>
    %cst_17 = arith.constant 1.000000e+00 : f32
    %61 = vector.broadcast %cst_17 : f32 to vector<8x64xf32>
    %62 = arith.addf %61, %60 : vector<8x64xf32>
    %63 = arith.divf %61, %62 : vector<8x64xf32>
    %64 = arith.mulf %58, %63 : vector<8x64xf32>
    %c64 = arith.constant 64 : index
    %c0_18 = arith.constant 0 : index
    %65 = vector.load %arg1[%c64, %c0_18] : memref<384x128xf32, #tpu.memory_space<vmem>>, vector<64x64xf32>
    %cst_19 = arith.constant dense<0.000000e+00> : vector<8x64xf32>
    %66 = tpu.matmul %64, %65, %cst_19 {dimension_numbers = #tpu.dot_dimension_numbers<[1], [0], [0], [1], [0, 0, 1, 1], [], []>} : vector<8x64xf32>, vector<64x64xf32>, vector<8x64xf32> -> vector<8x64xf32>
    %67 = vector.extract_strided_slice %1 {offsets = [5, 0], sizes = [1, 64], strides = [1, 1]} : vector<16x128xf32> to vector<1x64xf32>
    %68 = vector.broadcast %67 : vector<1x64xf32> to vector<8x64xf32>
    %69 = arith.addf %66, %68 : vector<8x64xf32>
    %70 = vector.extract_strided_slice %1 {offsets = [6, 0], sizes = [1, 64], strides = [1, 1]} : vector<16x128xf32> to vector<1x64xf32>
    %71 = vector.extract_strided_slice %1 {offsets = [7, 0], sizes = [1, 64], strides = [1, 1]} : vector<16x128xf32> to vector<1x64xf32>
    %cst_20 = arith.constant dense<0.000000e+00> : vector<8x64xf32>
    %72 = tpu.matmul %69, %38, %cst_20 {dimension_numbers = #tpu.dot_dimension_numbers<[1], [0], [0], [1], [0, 0, 1, 1], [], []>} : vector<8x64xf32>, vector<64x64xf32>, vector<8x64xf32> -> vector<8x64xf32>
    %73 = arith.mulf %69, %69 : vector<8x64xf32>
    %cst_21 = arith.constant dense<0.000000e+00> : vector<8x64xf32>
    %74 = tpu.matmul %73, %38, %cst_21 {dimension_numbers = #tpu.dot_dimension_numbers<[1], [0], [0], [1], [0, 0, 1, 1], [], []>} : vector<8x64xf32>, vector<64x64xf32>, vector<8x64xf32> -> vector<8x64xf32>
    %75 = arith.mulf %72, %72 : vector<8x64xf32>
    %76 = arith.subf %74, %75 : vector<8x64xf32>
    %77 = arith.subf %69, %72 : vector<8x64xf32>
    %cst_22 = arith.constant 9.99999974E-6 : f32
    %78 = vector.broadcast %cst_22 : f32 to vector<8x64xf32>
    %79 = arith.addf %76, %78 : vector<8x64xf32>
    %80 = math.rsqrt %79 : vector<8x64xf32>
    %81 = arith.mulf %77, %80 : vector<8x64xf32>
    %82 = vector.broadcast %70 : vector<1x64xf32> to vector<8x64xf32>
    %83 = arith.mulf %81, %82 : vector<8x64xf32>
    %84 = vector.broadcast %71 : vector<1x64xf32> to vector<8x64xf32>
    %85 = arith.addf %83, %84 : vector<8x64xf32>
    %86 = arith.negf %85 : vector<8x64xf32>
    %87 = math.exp %86 : vector<8x64xf32>
    %cst_23 = arith.constant 1.000000e+00 : f32
    %88 = vector.broadcast %cst_23 : f32 to vector<8x64xf32>
    %89 = arith.addf %88, %87 : vector<8x64xf32>
    %90 = arith.divf %88, %89 : vector<8x64xf32>
    %91 = arith.mulf %85, %90 : vector<8x64xf32>
    %c128 = arith.constant 128 : index
    %c0_24 = arith.constant 0 : index
    %92 = vector.load %arg1[%c128, %c0_24] : memref<384x128xf32, #tpu.memory_space<vmem>>, vector<64x64xf32>
    %cst_25 = arith.constant dense<0.000000e+00> : vector<8x64xf32>
    %93 = tpu.matmul %91, %92, %cst_25 {dimension_numbers = #tpu.dot_dimension_numbers<[1], [0], [0], [1], [0, 0, 1, 1], [], []>} : vector<8x64xf32>, vector<64x64xf32>, vector<8x64xf32> -> vector<8x64xf32>
    %94 = vector.extract_strided_slice %1 {offsets = [8, 0], sizes = [1, 64], strides = [1, 1]} : vector<16x128xf32> to vector<1x64xf32>
    %95 = vector.broadcast %94 : vector<1x64xf32> to vector<8x64xf32>
    %96 = arith.addf %93, %95 : vector<8x64xf32>
    %97 = vector.extract_strided_slice %1 {offsets = [9, 0], sizes = [1, 64], strides = [1, 1]} : vector<16x128xf32> to vector<1x64xf32>
    %98 = vector.extract_strided_slice %1 {offsets = [10, 0], sizes = [1, 64], strides = [1, 1]} : vector<16x128xf32> to vector<1x64xf32>
    %cst_26 = arith.constant dense<0.000000e+00> : vector<8x64xf32>
    %99 = tpu.matmul %96, %38, %cst_26 {dimension_numbers = #tpu.dot_dimension_numbers<[1], [0], [0], [1], [0, 0, 1, 1], [], []>} : vector<8x64xf32>, vector<64x64xf32>, vector<8x64xf32> -> vector<8x64xf32>
    %100 = arith.mulf %96, %96 : vector<8x64xf32>
    %cst_27 = arith.constant dense<0.000000e+00> : vector<8x64xf32>
    %101 = tpu.matmul %100, %38, %cst_27 {dimension_numbers = #tpu.dot_dimension_numbers<[1], [0], [0], [1], [0, 0, 1, 1], [], []>} : vector<8x64xf32>, vector<64x64xf32>, vector<8x64xf32> -> vector<8x64xf32>
    %102 = arith.mulf %99, %99 : vector<8x64xf32>
    %103 = arith.subf %101, %102 : vector<8x64xf32>
    %104 = arith.subf %96, %99 : vector<8x64xf32>
    %cst_28 = arith.constant 9.99999974E-6 : f32
    %105 = vector.broadcast %cst_28 : f32 to vector<8x64xf32>
    %106 = arith.addf %103, %105 : vector<8x64xf32>
    %107 = math.rsqrt %106 : vector<8x64xf32>
    %108 = arith.mulf %104, %107 : vector<8x64xf32>
    %109 = vector.broadcast %97 : vector<1x64xf32> to vector<8x64xf32>
    %110 = arith.mulf %108, %109 : vector<8x64xf32>
    %111 = vector.broadcast %98 : vector<1x64xf32> to vector<8x64xf32>
    %112 = arith.addf %110, %111 : vector<8x64xf32>
    %113 = arith.negf %112 : vector<8x64xf32>
    %114 = math.exp %113 : vector<8x64xf32>
    %cst_29 = arith.constant 1.000000e+00 : f32
    %115 = vector.broadcast %cst_29 : f32 to vector<8x64xf32>
    %116 = arith.addf %115, %114 : vector<8x64xf32>
    %117 = arith.divf %115, %116 : vector<8x64xf32>
    %118 = arith.mulf %112, %117 : vector<8x64xf32>
    %c192 = arith.constant 192 : index
    %c0_30 = arith.constant 0 : index
    %119 = vector.load %arg1[%c192, %c0_30] : memref<384x128xf32, #tpu.memory_space<vmem>>, vector<64x64xf32>
    %cst_31 = arith.constant dense<0.000000e+00> : vector<8x64xf32>
    %120 = tpu.matmul %118, %119, %cst_31 {dimension_numbers = #tpu.dot_dimension_numbers<[1], [0], [0], [1], [0, 0, 1, 1], [], []>} : vector<8x64xf32>, vector<64x64xf32>, vector<8x64xf32> -> vector<8x64xf32>
    %121 = vector.extract_strided_slice %1 {offsets = [11, 0], sizes = [1, 64], strides = [1, 1]} : vector<16x128xf32> to vector<1x64xf32>
    %122 = vector.broadcast %121 : vector<1x64xf32> to vector<8x64xf32>
    %123 = arith.addf %120, %122 : vector<8x64xf32>
    %124 = vector.extract_strided_slice %1 {offsets = [12, 0], sizes = [1, 64], strides = [1, 1]} : vector<16x128xf32> to vector<1x64xf32>
    %125 = vector.extract_strided_slice %1 {offsets = [13, 0], sizes = [1, 64], strides = [1, 1]} : vector<16x128xf32> to vector<1x64xf32>
    %cst_32 = arith.constant dense<0.000000e+00> : vector<8x64xf32>
    %126 = tpu.matmul %123, %38, %cst_32 {dimension_numbers = #tpu.dot_dimension_numbers<[1], [0], [0], [1], [0, 0, 1, 1], [], []>} : vector<8x64xf32>, vector<64x64xf32>, vector<8x64xf32> -> vector<8x64xf32>
    %127 = arith.mulf %123, %123 : vector<8x64xf32>
    %cst_33 = arith.constant dense<0.000000e+00> : vector<8x64xf32>
    %128 = tpu.matmul %127, %38, %cst_33 {dimension_numbers = #tpu.dot_dimension_numbers<[1], [0], [0], [1], [0, 0, 1, 1], [], []>} : vector<8x64xf32>, vector<64x64xf32>, vector<8x64xf32> -> vector<8x64xf32>
    %129 = arith.mulf %126, %126 : vector<8x64xf32>
    %130 = arith.subf %128, %129 : vector<8x64xf32>
    %131 = arith.subf %123, %126 : vector<8x64xf32>
    %cst_34 = arith.constant 9.99999974E-6 : f32
    %132 = vector.broadcast %cst_34 : f32 to vector<8x64xf32>
    %133 = arith.addf %130, %132 : vector<8x64xf32>
    %134 = math.rsqrt %133 : vector<8x64xf32>
    %135 = arith.mulf %131, %134 : vector<8x64xf32>
    %136 = vector.broadcast %124 : vector<1x64xf32> to vector<8x64xf32>
    %137 = arith.mulf %135, %136 : vector<8x64xf32>
    %138 = vector.broadcast %125 : vector<1x64xf32> to vector<8x64xf32>
    %139 = arith.addf %137, %138 : vector<8x64xf32>
    %140 = arith.negf %139 : vector<8x64xf32>
    %141 = math.exp %140 : vector<8x64xf32>
    %cst_35 = arith.constant 1.000000e+00 : f32
    %142 = vector.broadcast %cst_35 : f32 to vector<8x64xf32>
    %143 = arith.addf %142, %141 : vector<8x64xf32>
    %144 = arith.divf %142, %143 : vector<8x64xf32>
    %145 = arith.mulf %139, %144 : vector<8x64xf32>
    %c320 = arith.constant 320 : index
    %c0_36 = arith.constant 0 : index
    %146 = vector.load %arg1[%c320, %c0_36] : memref<384x128xf32, #tpu.memory_space<vmem>>, vector<64x2xf32>
    %cst_37 = arith.constant dense<0.000000e+00> : vector<8x2xf32>
    %147 = tpu.matmul %145, %146, %cst_37 {dimension_numbers = #tpu.dot_dimension_numbers<[1], [0], [0], [1], [0, 0, 1, 1], [], []>} : vector<8x64xf32>, vector<64x2xf32>, vector<8x2xf32> -> vector<8x2xf32>
    %148 = vector.extract_strided_slice %1 {offsets = [14, 0], sizes = [1, 2], strides = [1, 1]} : vector<16x128xf32> to vector<1x2xf32>
    %149 = vector.broadcast %148 : vector<1x2xf32> to vector<8x2xf32>
    %150 = arith.addf %147, %149 : vector<8x2xf32>
    %c0_38 = arith.constant 0 : index
    %c0_39 = arith.constant 0 : index
    %151 = vector.load %arg3[%c0_38, %c0_39] : memref<8x2xf32, #tpu.memory_space<vmem>>, vector<8x2xf32>
    tpu.vector_store %arg3[%c0_38, %c0_39], %150 {strides = array<i32>} : memref<8x2xf32, #tpu.memory_space<vmem>>, vector<8x2xf32>,
    return
  }
}

</mosaic_0001>

<bundles_post_ra>
// kernel: critic_forward.1
= control target key start
LH: loop header
LB: loop body
LE: loop exit
PB: predicated region body
PF: predicated region fallthrough
CT: control target
= control target key end

     0   :  { %8 = vsyncpa [#allocation3], 0  ;;  %s709_s15 = smov [#allocation2]   ;;  %s710_s17 = smov 128   ;;  %s862_s0 = inlined_call_operand.vmem [shape: f32[8,40], index: 0, kind: input, shape index: {}]   ;;  %s863_s1 = inlined_call_operand.hbm [shape: f32[384,128], index: 1, kind: input, shape index: {}]   ;;  %s864_s2 = inlined_call_operand.vmem [shape: f32[16,128], index: 2, kind: input, shape index: {}]   ;;  %s865_s3 = inlined_call_operand.vmem [shape: f32[8,2], index: 3, kind: output, shape index: {}]  }
   0x1   :  { %s15_s14 = sshll.u32 %s863_s1, 4  ;;  %s17_s16 = sshll.u32 %s709_s15, 4  ;;  %s16_s14 = int_to_ptr.hbm [resolvable:$true] %s15_s14  ;;  %s18_s16 = int_to_ptr.vmem [resolvable:$true] %s17_s16 }
   0x2   :  { %s711_s18 = smov 8  }
   0x3   :  { %23 = dma.hbm_to_vmem [thread:$0]  %s16_s14, 6144, %s18_s16, [#allocation3], %s710_s17, %s710_s17, %s711_s18  }
   0x4   :  { %707 = dma.done.wait [#allocation3], 6144  }
   0x5   :  { %708 = vsyncadd [#allocation3], 4294961152  ;;  %v37_v0 = vld [vmem:[#allocation2 + $0x20] sm:$0xff]  ;;  %v36_v1 = vld [vmem:[#allocation2 + $0x18] sm:$0xff]  ;;  %vm39_vm0 = vcmask 326656   ;;  %vm63_vm1 = vcmask 195584  }
   0x6   :  { %54 = vmatpush.msra.mxu0 %v37_v0  ;;  %v35_v2 = vld [vmem:[#allocation2 + $0x10] sm:$0xff]  ;;  %v34_v3 = vld [vmem:[#allocation2 + $0x8] sm:$0xff]  ;;  %v33_v4 = vld [vmem:[#allocation2] sm:$0xff]  ;;  %s712_s22 = smov 64   ;;  %vm150_vm9 = vcmask 523264  }
   0x7   :  { %v30_v5 = vld [vmem:[%s862_s0] sm:$0xff]  ;;  %v122_v14 = vld [vmem:[#allocation2 + $0x38] sm:$0xff]  ;;  %v121_v15 = vld [vmem:[#allocation2 + $0x30] sm:$0xff] }
   0x8   :  { %55 = vmatpush.msra.mxu0 %v36_v1  ;;  %v742_v6 = vld [vmem:[%s864_s2] sm:$0xff]  ;;  %143 = vmatpush.msra.mxu1 %v122_v14  ;;  %v120_v16 = vld [vmem:[#allocation2 + $0x28] sm:$0xff]  ;;  %v749_v36 = vld [vmem:[#allocation2 + $0x138] sm:$0xff] }
   0x9   :  { %v38_v7 = vperm.slane %v742_v6, 0  ;;  %v88_v30 = vperm.slane %v742_v6, 1  ;;  %v90_v33 = vperm.slane %v742_v6, 2  ;;  %v751_v37 = vld [vmem:[#allocation2 + $0x130] sm:$0xff]  ;;  %162 = vmatpush.msra.mxu2 %v749_v36  ;;  %186 = vmatpush.msra.mxu3 %v749_v36  ;;  %v755_v39 = vld [vmem:[#allocation2 + $0x128] sm:$0xff]  ;;  %v760_v40 = vld [vmem:[#allocation2 + $0x120] sm:$0xff] }
   0xa   :  { %56 = vmatpush.msra.mxu0 %v35_v2  ;;  %144 = vmatpush.msra.mxu1 %v121_v15  ;;  %v765_v41 = vld [vmem:[#allocation2 + $0x118] sm:$0xff]  ;;  %v770_v42 = vld [vmem:[#allocation2 + $0x110] sm:$0xff]  ;;  %v780_v56 = vld [vmem:[#allocation2 + $0x108] sm:$0xff] }
   0xb   :  { %163 = vmatpush.msra.mxu2 %v751_v37  ;;  %187 = vmatpush.msra.mxu3 %v751_v37  ;;  %v784_v57 = vld [vmem:[#allocation2 + $0x100] sm:$0xff]  ;;  %v244_v62 = vld [vmem:[#allocation2 + $0x78] sm:$0xff]  ;;  %v243_v63 = vld [vmem:[#allocation2 + $0x70] sm:$0xff] }
   0xc   :  { %57 = vmatpush.msra.mxu0 %v34_v3  ;;  %145 = vmatpush.msra.mxu1 %v120_v16  ;;  %v242_v0 = vld [vmem:[#allocation2 + $0x68] sm:$0xff]  ;;  %v241_v1 = vld [vmem:[#allocation2 + $0x60] sm:$0xff]  ;;  %v240_v2 = vld [vmem:[#allocation2 + $0x58] sm:$0xff] }
   0xd   :  { %164 = vmatpush.msra.mxu2 %v755_v39  ;;  %188 = vmatpush.msra.mxu3 %v755_v39 }
   0xe   :  { %58 = vmatpush.msra.mxu0 %v33_v4  ;;  %257 = vmatpush.msrb.mxu1 %v244_v62 }
   0xf   :  { %630 = vmatmul.msk.f32.vlgmr.msra.gmra.mxu0 %vm39_vm0, %v30_v5  ;;  %165 = vmatpush.msra.mxu2 %v760_v40  ;;  %v239_v5 = vld [vmem:[#allocation2 + $0x50] sm:$0xff] }
  0x10   :  { %280 = vmatpush.msrb.mxu0 %v749_v36  ;;  %189 = vmatpush.msra.mxu3 %v760_v40 }
  0x11   :  { %166 = vmatpush.msra.mxu2 %v765_v41  ;;  %258 = vmatpush.msrb.mxu1 %v243_v63  ;;  %v355_v63 = vld [vmem:[#allocation2 + $0x80] sm:$0xff] }
  0x12   :  { %281 = vmatpush.msrb.mxu0 %v751_v37  ;;  %190 = vmatpush.msra.mxu3 %v765_v41 }
  0x13   :  { %167 = vmatpush.msra.mxu2 %v770_v42  ;;  %259 = vmatpush.msrb.mxu1 %v242_v0 }
  0x14   :  { %282 = vmatpush.msrb.mxu0 %v755_v39  ;;  %191 = vmatpush.msra.mxu3 %v770_v42 }
  0x15   :  { %168 = vmatpush.msra.mxu2 %v780_v56  ;;  %260 = vmatpush.msrb.mxu1 %v241_v1 }
  0x16   :  { %283 = vmatpush.msrb.mxu0 %v760_v40  ;;  %192 = vmatpush.msra.mxu3 %v780_v56 }
  0x17   :  { %169 = vmatpush.msra.mxu2 %v784_v57  ;;  %261 = vmatpush.msrb.mxu1 %v240_v2 }
  0x18   :  { %284 = vmatpush.msrb.mxu0 %v765_v41  ;;  %193 = vmatpush.msra.mxu3 %v784_v57 }
  0x19   :  { %304 = vmatpush.msrb.mxu2 %v749_v36  ;;  %262 = vmatpush.msrb.mxu1 %v239_v5 }
  0x1a   :  { %285 = vmatpush.msrb.mxu0 %v770_v42 }
  0x1b   :  { %305 = vmatpush.msrb.mxu2 %v751_v37 }
  0x1c   :  { %286 = vmatpush.msrb.mxu0 %v780_v56 }
  0x1d   :  { %306 = vmatpush.msrb.mxu2 %v755_v39 }
  0x1e   :  { %287 = vmatpush.msrb.mxu0 %v784_v57 }
  0x1f   :  { %307 = vmatpush.msrb.mxu2 %v760_v40 }
  0x20   :  { %422 = vmatpush.msra.mxu0 %v749_v36 }
  0x21   :  { %308 = vmatpush.msrb.mxu2 %v765_v41 }
  0x22   :  { %423 = vmatpush.msra.mxu0 %v751_v37 }
  0x23   :  { %309 = vmatpush.msrb.mxu2 %v770_v42 }
  0x24   :  { %424 = vmatpush.msra.mxu0 %v755_v39 }
  0x25   :  { %310 = vmatpush.msrb.mxu2 %v780_v56 }
  0x26   :  { %425 = vmatpush.msra.mxu0 %v760_v40 }
  0x27   :  { %311 = vmatpush.msrb.mxu2 %v784_v57 }
  0x28   :  { %426 = vmatpush.msra.mxu0 %v765_v41 }
  0x2a   :  { %427 = vmatpush.msra.mxu0 %v770_v42 }
  0x2c   :  { %428 = vmatpush.msra.mxu0 %v780_v56 }
  0x2e   :  { %429 = vmatpush.msra.mxu0 %v784_v57 }
  0x8c   :  { %v60_v8 = vpop.f32.mrf.mxu0 }
  0x8d   :  { %v61_v9 = vadd.f32 %v60_v8, %v38_v7 }
  0x8f   :  { %124 = vrot.lane.b32.xlu1 %v61_v9, %s712_s22  ;;  %v64_v10 = vsel %vm63_vm1, %v61_v9, 0.0  ;;  %v67_v11 = vmul.f32 %v61_v9, %v61_v9 }
  0x90   :  { %65 = vadd.xlane.f32.xlu0 %v64_v10 }
  0x91   :  { %v68_v12 = vsel %vm63_vm1, %v67_v11, 0.0  ;;  %v237_v11 = vld [vmem:[#allocation2 + $0x40] sm:$0xff] }
  0x98   :  { %69 = vadd.xlane.f32.xlu0 %v68_v12 }
 0x101   :  { %v125_v58 = vpop.permute.xlu1 %124 }
 0x103   :  { %v66_v13 = vpop.xlane.xlu0 %65 }
 0x104   :  { %v71_v17 = vmul.f32 0.041666668, %v66_v13 }
 0x106   :  { %v73_v19 = vmul.f32 %v71_v17, %v71_v17  ;;  %v75_v29 = vsub.f32 %v61_v9, %v71_v17  ;;  %v238_v9 = vld [vmem:[#allocation2 + $0x48] sm:$0xff] }
 0x107   :  { %263 = vmatpush.msrb.mxu1 %v238_v9 }
 0x109   :  { %264 = vmatpush.msrb.mxu1 %v237_v11 }
 0x10b   :  { %v70_v18 = vpop.xlane.xlu0 %69 }
 0x10c   :  { %v72_v20 = vmul.f32 0.041666668, %v70_v18 }
 0x10e   :  { %v74_v21 = vsub.f32 %v72_v20, %v73_v19  ;;  %v213_v19 = vperm.slane %v742_v6, 3 }
 0x110   :  { %v76_v22 = vadd.f32 1e-05, %v74_v21 }
 0x112   :  { %653 = vrsqrt.f32 %v76_v22  ;;  %vm83_vm3 = vweird.f32 %v76_v22 }
 0x118   :  { %v654_v23 = vpop.eup %653 }
 0x119   :  { %v78_v24 = vmul.f32 %v654_v23, %v76_v22  ;;  %vm84_vm2 = vweird.f32 %v654_v23  ;;  %v215_v22 = vperm.slane %v742_v6, 4 }
 0x11a   :  { %vm85_vm4 = vmor %vm83_vm3, %vm84_vm2 }
 0x11b   :  { %v79_v25 = vmul.f32 %v654_v23, %v78_v24 }
 0x11d   :  { %v80_v26 = vmul.f32 0.5, %v79_v25 }
 0x11f   :  { %v81_v27 = vsub.f32 1.5, %v80_v26 }
 0x121   :  { %v82_v28 = vmul.f32 %v654_v23, %v81_v27 }
 0x123   :  { %v86_v31 = vsel %vm85_vm4, %v654_v23, %v82_v28 }
 0x124   :  { %v87_v32 = vmul.f32 %v86_v31, %v75_v29 }
 0x126   :  { %v89_v34 = vmul.f32 %v88_v30, %v87_v32 }
 0x128   :  { %v91_v35 = vadd.f32 %v90_v33, %v89_v34 }
 0x12a   :  { %v631_v38 = vmul.f32 -1.442695, %v91_v35 }
 0x12c   :  { %655 = vpow2.f32 %v631_v38 }
 0x132   :  { %v656_v43 = vpop.eup %655 }
 0x133   :  { %v95_v44 = vadd.f32 1.0, %v656_v43 }
 0x135   :  { %657 = vrcp.f32 %v95_v44  ;;  %v107_v48 = vand.u32 2147483648, %v95_v44  ;;  %v105_v50 = vand.u32 2147483647, %v95_v44  ;;  %vm101_vm6 = vweird.f32 %v95_v44 }
 0x137   :  { %v108_v52 = vor.u32 1.1754944e-38, %v107_v48  ;;  %vm106_vm8 = vcmp.eq.f32.partialorder %v105_v50, 8.507059e+37  ;;  %v361_v50 = vld [vmem:[#allocation2 + $0xb0] sm:$0xff] }
 0x13b   :  { %v658_v45 = vpop.eup %657 }
 0x13c   :  { %v97_v46 = vmul.f32 %v658_v45, %v95_v44  ;;  %vm102_vm5 = vweird.f32 %v658_v45 }
 0x13d   :  { %vm103_vm7 = vmor %vm101_vm6, %vm102_vm5 }
 0x13e   :  { %v98_v47 = vsub.f32 1.0, %v97_v46 }
 0x140   :  { %v99_v49 = vmul.f32 %v658_v45, %v98_v47 }
 0x142   :  { %v100_v51 = vadd.f32 %v658_v45, %v99_v49  ;;  %v362_v49 = vld [vmem:[#allocation2 + $0xb8] sm:$0xff] }
 0x143   :  { %375 = vmatpush.msrb.mxu3 %v362_v49 }
 0x144   :  { %v104_v53 = vsel %vm103_vm7, %v658_v45, %v100_v51  ;;  %v245_v45 = vperm.slane %v742_v6, 5  ;;  %v360_v51 = vld [vmem:[#allocation2 + $0xa8] sm:$0xff] }
 0x145   :  { %v109_v54 = vsel %vm106_vm8, %v108_v52, %v104_v53  ;;  %376 = vmatpush.msrb.mxu3 %v361_v50  ;;  %v359_v52 = vld [vmem:[#allocation2 + $0xa0] sm:$0xff] }
 0x146   :  { %v111_v55 = vmul.f32 %v109_v54, %v91_v35  ;;  %v358_v54 = vld [vmem:[#allocation2 + $0x98] sm:$0xff] }
 0x147   :  { %377 = vmatpush.msrb.mxu3 %v360_v51 }
 0x148   :  { %632 = vmatmul.msk.f32.vlgmr.msra.gmra.mxu1 %vm63_vm1, %v111_v55 }
 0x149   :  { %398 = vmatpush.msra.mxu1 %v749_v36  ;;  %378 = vmatpush.msrb.mxu3 %v359_v52 }
 0x14b   :  { %399 = vmatpush.msra.mxu1 %v751_v37  ;;  %379 = vmatpush.msrb.mxu3 %v358_v54 }
 0x14d   :  { %400 = vmatpush.msra.mxu1 %v755_v39 }
 0x14f   :  { %401 = vmatpush.msra.mxu1 %v760_v40 }
 0x151   :  { %402 = vmatpush.msra.mxu1 %v765_v41 }
 0x153   :  { %403 = vmatpush.msra.mxu1 %v770_v42 }
 0x155   :  { %404 = vmatpush.msra.mxu1 %v780_v56 }
 0x157   :  { %405 = vmatpush.msra.mxu1 %v784_v57 }
 0x1c5   :  { %v147_v59 = vpop.f32.mrf.mxu1 }
 0x1c6   :  { %v148_v60 = vadd.f32 %v147_v59, %v125_v58  ;;  %v357_v58 = vld [vmem:[#allocation2 + $0x90] sm:$0xff] }
 0x1c7   :  { %380 = vmatpush.msrb.mxu3 %v357_v58 }
 0x1c8   :  { %633 = vmatmul.msk.f32.vlgmr.msra.gmra.mxu2 %vm150_vm9, %v148_v60  ;;  %v174_v61 = vmul.f32 %v148_v60, %v148_v60 }
 0x1ca   :  { %634 = vmatmul.msk.f32.vlgmr.msra.gmra.mxu3 %vm150_vm9, %v174_v61  ;;  %v356_v61 = vld [vmem:[#allocation2 + $0x88] sm:$0xff] }
 0x1cb   :  { %381 = vmatpush.msrb.mxu3 %v356_v61 }
 0x1cd   :  { %382 = vmatpush.msrb.mxu3 %v355_v63 }
 0x1cf   :  { %516 = vmatpush.msra.mxu3 %v749_v36 }
 0x1d1   :  { %517 = vmatpush.msra.mxu3 %v751_v37 }
 0x1d3   :  { %518 = vmatpush.msra.mxu3 %v755_v39 }
 0x1d5   :  { %519 = vmatpush.msra.mxu3 %v760_v40 }
 0x1d7   :  { %520 = vmatpush.msra.mxu3 %v765_v41 }
 0x1d9   :  { %521 = vmatpush.msra.mxu3 %v770_v42 }
 0x1db   :  { %522 = vmatpush.msra.mxu3 %v780_v56 }
 0x1dd   :  { %523 = vmatpush.msra.mxu3 %v784_v57 }
 0x24b   :  { %v171_v3 = vpop.f32.mrf.mxu2 }
 0x24c   :  { %v198_v4 = vmul.f32 %v171_v3, %v171_v3  ;;  %v200_v18 = vsub.f32 %v148_v60, %v171_v3 }
 0x24d   :  { %v195_v7 = vpop.f32.mrf.mxu3 }
 0x24e   :  { %v199_v8 = vsub.f32 %v195_v7, %v198_v4  ;;  %v333_v7 = vperm.slane %v742_v6, 7 }
 0x250   :  { %v201_v10 = vadd.f32 1e-05, %v199_v8 }
 0x252   :  { %659 = vrsqrt.f32 %v201_v10  ;;  %vm208_vm11 = vweird.f32 %v201_v10 }
 0x258   :  { %v660_v12 = vpop.eup %659 }
 0x259   :  { %v203_v13 = vmul.f32 %v660_v12, %v201_v10  ;;  %vm209_vm10 = vweird.f32 %v660_v12 }
 0x25a   :  { %vm210_vm12 = vmor %vm208_vm11, %vm209_vm10 }
 0x25b   :  { %v204_v14 = vmul.f32 %v660_v12, %v203_v13 }
 0x25d   :  { %v205_v15 = vmul.f32 0.5, %v204_v14 }
 0x25f   :  { %v206_v16 = vsub.f32 1.5, %v205_v15 }
 0x261   :  { %v207_v17 = vmul.f32 %v660_v12, %v206_v16 }
 0x263   :  { %v211_v20 = vsel %vm210_vm12, %v660_v12, %v207_v17 }
 0x264   :  { %v212_v21 = vmul.f32 %v211_v20, %v200_v18 }
 0x266   :  { %v214_v23 = vmul.f32 %v213_v19, %v212_v21  ;;  %v844_v19 = vld [vmem:[%s864_s2 + $0x8] sm:$0xff] }
 0x267   :  { %v363_v20 = vperm.slane %v844_v19, 0  ;;  %v449_v50 = vperm.slane %v844_v19, 1 }
 0x268   :  { %v216_v24 = vadd.f32 %v215_v22, %v214_v23 }
 0x26a   :  { %v635_v25 = vmul.f32 -1.442695, %v216_v24 }
 0x26c   :  { %661 = vpow2.f32 %v635_v25 }
 0x272   :  { %v662_v26 = vpop.eup %661 }
 0x273   :  { %v220_v27 = vadd.f32 1.0, %v662_v26 }
 0x275   :  { %663 = vrcp.f32 %v220_v27  ;;  %v232_v31 = vand.u32 2147483648, %v220_v27  ;;  %v230_v33 = vand.u32 2147483647, %v220_v27  ;;  %vm226_vm14 = vweird.f32 %v220_v27 }
 0x277   :  { %v233_v35 = vor.u32 1.1754944e-38, %v232_v31  ;;  %vm231_vm0 = vcmp.eq.f32.partialorder %v230_v33, 8.507059e+37  ;;  %v478_v31 = vld [vmem:[#allocation2 + $0xe8] sm:$0xff] }
 0x27b   :  { %v664_v28 = vpop.eup %663 }
 0x27c   :  { %v222_v29 = vmul.f32 %v664_v28, %v220_v27  ;;  %vm227_vm13 = vweird.f32 %v664_v28 }
 0x27d   :  { %vm228_vm15 = vmor %vm226_vm14, %vm227_vm13 }
 0x27e   :  { %v223_v30 = vsub.f32 1.0, %v222_v29  ;;  %v480_v29 = vld [vmem:[#allocation2 + $0xf8] sm:$0xff] }
 0x27f   :  { %493 = vmatpush.msra.mxu2 %v480_v29  ;;  %v591_v29 = vld [vmem:[#allocation2 + $0x140] sm:$0xff] }
 0x280   :  { %v224_v32 = vmul.f32 %v664_v28, %v223_v30  ;;  %v479_v30 = vld [vmem:[#allocation2 + $0xf0] sm:$0xff] }
 0x281   :  { %494 = vmatpush.msra.mxu2 %v479_v30 }
 0x282   :  { %v225_v34 = vadd.f32 %v664_v28, %v224_v32 }
 0x283   :  { %495 = vmatpush.msra.mxu2 %v478_v31 }
 0x284   :  { %v229_v38 = vsel %vm228_vm15, %v664_v28, %v225_v34  ;;  %v477_v34 = vld [vmem:[#allocation2 + $0xe0] sm:$0xff] }
 0x285   :  { %v234_v43 = vsel %vm231_vm0, %v233_v35, %v229_v38  ;;  %v476_v38 = vld [vmem:[#allocation2 + $0xd8] sm:$0xff]  ;;  %496 = vmatpush.msra.mxu2 %v477_v34 }
 0x286   :  { %v236_v44 = vmul.f32 %v234_v43, %v216_v24 }
 0x287   :  { %497 = vmatpush.msra.mxu2 %v476_v38 }
 0x288   :  { %636 = vmatmul.msk.f32.vlgmr.msrb.gmra.mxu1 %vm150_vm9, %v236_v44  ;;  %v475_v44 = vld [vmem:[#allocation2 + $0xd0] sm:$0xff] }
 0x289   :  { %540 = vmatpush.msrb.mxu1 %v749_v36  ;;  %498 = vmatpush.msra.mxu2 %v475_v44 }
 0x28b   :  { %541 = vmatpush.msrb.mxu1 %v751_v37  ;;  %v331_v37 = vperm.slane %v742_v6, 6 }
 0x28d   :  { %542 = vmatpush.msrb.mxu1 %v755_v39 }
 0x28f   :  { %543 = vmatpush.msrb.mxu1 %v760_v40 }
 0x291   :  { %544 = vmatpush.msrb.mxu1 %v765_v41 }
 0x293   :  { %545 = vmatpush.msrb.mxu1 %v770_v42 }
 0x295   :  { %546 = vmatpush.msrb.mxu1 %v780_v56 }
 0x297   :  { %547 = vmatpush.msrb.mxu1 %v784_v57 }
 0x305   :  { %v266_v46 = vpop.f32.mrf.mxu1 }
 0x306   :  { %v267_v47 = vadd.f32 %v266_v46, %v245_v45  ;;  %v474_v46 = vld [vmem:[#allocation2 + $0xc8] sm:$0xff] }
 0x307   :  { %499 = vmatpush.msra.mxu2 %v474_v46 }
 0x308   :  { %v292_v48 = vmul.f32 %v267_v47, %v267_v47  ;;  %637 = vmatmul.msk.f32.vlgmr.msrb.gmra.mxu0 %vm150_vm9, %v267_v47 }
 0x30a   :  { %638 = vmatmul.msk.f32.vlgmr.msrb.gmra.mxu2 %vm150_vm9, %v292_v48  ;;  %v473_v48 = vld [vmem:[#allocation2 + $0xc0] sm:$0xff] }
 0x30b   :  { %500 = vmatpush.msra.mxu2 %v473_v48 }
 0x385   :  { %v289_v53 = vpop.f32.mrf.mxu0 }
 0x386   :  { %v316_v55 = vmul.f32 %v289_v53, %v289_v53  ;;  %v318_v36 = vsub.f32 %v267_v47, %v289_v53  ;;  %v451_v53 = vperm.slane %v844_v19, 2 }
 0x38d   :  { %v313_v59 = vpop.f32.mrf.mxu2 }
 0x38e   :  { %v317_v60 = vsub.f32 %v313_v59, %v316_v55 }
 0x390   :  { %v319_v62 = vadd.f32 1e-05, %v317_v60 }
 0x392   :  { %665 = vrsqrt.f32 %v319_v62  ;;  %vm326_vm2 = vweird.f32 %v319_v62 }
 0x398   :  { %v666_v0 = vpop.eup %665 }
 0x399   :  { %v321_v1 = vmul.f32 %v666_v0, %v319_v62  ;;  %vm327_vm1 = vweird.f32 %v666_v0 }
 0x39a   :  { %vm328_vm3 = vmor %vm326_vm2, %vm327_vm1 }
 0x39b   :  { %v322_v2 = vmul.f32 %v666_v0, %v321_v1 }
 0x39d   :  { %v323_v3 = vmul.f32 0.5, %v322_v2 }
 0x39f   :  { %v324_v4 = vsub.f32 1.5, %v323_v3 }
 0x3a1   :  { %v325_v5 = vmul.f32 %v666_v0, %v324_v4 }
 0x3a3   :  { %v329_v39 = vsel %vm328_vm3, %v666_v0, %v325_v5 }
 0x3a4   :  { %v330_v40 = vmul.f32 %v329_v39, %v318_v36  ;;  %v481_v39 = vperm.slane %v844_v19, 3 }
 0x3a6   :  { %v332_v41 = vmul.f32 %v331_v37, %v330_v40 }
 0x3a8   :  { %v334_v8 = vadd.f32 %v333_v7, %v332_v41 }
 0x3aa   :  { %v639_v9 = vmul.f32 -1.442695, %v334_v8 }
 0x3ac   :  { %667 = vpow2.f32 %v639_v9 }
 0x3b2   :  { %v668_v42 = vpop.eup %667 }
 0x3b3   :  { %v338_v10 = vadd.f32 1.0, %v668_v42 }
 0x3b5   :  { %669 = vrcp.f32 %v338_v10  ;;  %v350_v13 = vand.u32 2147483648, %v338_v10  ;;  %v348_v15 = vand.u32 2147483647, %v338_v10  ;;  %vm344_vm5 = vweird.f32 %v338_v10 }
 0x3b7   :  { %v351_v57 = vor.u32 1.1754944e-38, %v350_v13  ;;  %vm349_vm7 = vcmp.eq.f32.partialorder %v348_v15, 8.507059e+37 }
 0x3bb   :  { %v670_v56 = vpop.eup %669 }
 0x3bc   :  { %v340_v11 = vmul.f32 %v670_v56, %v338_v10  ;;  %vm345_vm4 = vweird.f32 %v670_v56 }
 0x3bd   :  { %vm346_vm6 = vmor %vm344_vm5, %vm345_vm4 }
 0x3be   :  { %v341_v12 = vsub.f32 1.0, %v340_v11 }
 0x3c0   :  { %v342_v14 = vmul.f32 %v670_v56, %v341_v12  ;;  %v598_v12 = vld [vmem:[#allocation2 + $0x178] sm:$0xff] }
 0x3c1   :  { %611 = vmatpush.msrb.mxu0 %v598_v12 }
 0x3c2   :  { %v343_v16 = vadd.f32 %v670_v56, %v342_v14  ;;  %v597_v14 = vld [vmem:[#allocation2 + $0x170] sm:$0xff] }
 0x3c3   :  { %612 = vmatpush.msrb.mxu0 %v597_v14 }
 0x3c4   :  { %v347_v17 = vsel %vm346_vm6, %v670_v56, %v343_v16  ;;  %v596_v16 = vld [vmem:[#allocation2 + $0x168] sm:$0xff] }
 0x3c5   :  { %v352_v6 = vsel %vm349_vm7, %v351_v57, %v347_v17  ;;  %613 = vmatpush.msrb.mxu0 %v596_v16  ;;  %v595_v17 = vld [vmem:[#allocation2 + $0x160] sm:$0xff]  ;;  %vm623_vm7 = vcmask 15360  }
 0x3c6   :  { %v354_v18 = vmul.f32 %v352_v6, %v334_v8 }
 0x3c7   :  { %614 = vmatpush.msrb.mxu0 %v595_v17 }
 0x3c8   :  { %640 = vmatmul.msk.f32.vlgmr.msrb.gmra.mxu3 %vm150_vm9, %v354_v18  ;;  %v594_v18 = vld [vmem:[#allocation2 + $0x158] sm:$0xff] }
 0x3c9   :  { %615 = vmatpush.msrb.mxu0 %v594_v18 }
 0x44b   :  { %v384_v21 = vpop.f32.mrf.mxu3 }
 0x44c   :  { %v385_v22 = vadd.f32 %v384_v21, %v363_v20 }
 0x44e   :  { %v410_v23 = vmul.f32 %v385_v22, %v385_v22  ;;  %641 = vmatmul.msk.f32.vlgmr.msra.gmra.mxu1 %vm150_vm9, %v385_v22 }
 0x450   :  { %642 = vmatmul.msk.f32.vlgmr.msra.gmra.mxu0 %vm150_vm9, %v410_v23  ;;  %v593_v23 = vld [vmem:[#allocation2 + $0x150] sm:$0xff] }
 0x451   :  { %616 = vmatpush.msrb.mxu0 %v593_v23 }
 0x4cb   :  { %v407_v24 = vpop.f32.mrf.mxu1 }
 0x4cc   :  { %v434_v25 = vmul.f32 %v407_v24, %v407_v24  ;;  %v436_v49 = vsub.f32 %v385_v22, %v407_v24  ;;  %v567_v22 = vperm.slane %v844_v19, 4 }
 0x4cd   :  { %v431_v26 = vpop.f32.mrf.mxu0 }
 0x4ce   :  { %v435_v27 = vsub.f32 %v431_v26, %v434_v25  ;;  %v569_v26 = vperm.slane %v844_v19, 5 }
 0x4d0   :  { %v437_v28 = vadd.f32 1e-05, %v435_v27  ;;  %v592_v27 = vld [vmem:[#allocation2 + $0x148] sm:$0xff] }
 0x4d1   :  { %617 = vmatpush.msrb.mxu0 %v592_v27 }
 0x4d2   :  { %671 = vrsqrt.f32 %v437_v28  ;;  %vm444_vm10 = vweird.f32 %v437_v28 }
 0x4d3   :  { %618 = vmatpush.msrb.mxu0 %v591_v29 }
 0x4d8   :  { %v672_v32 = vpop.eup %671 }
 0x4d9   :  { %v439_v33 = vmul.f32 %v672_v32, %v437_v28  ;;  %vm445_vm8 = vweird.f32 %v672_v32 }
 0x4da   :  { %vm446_vm11 = vmor %vm444_vm10, %vm445_vm8 }
 0x4db   :  { %v440_v35 = vmul.f32 %v672_v32, %v439_v33 }
 0x4dd   :  { %v441_v43 = vmul.f32 0.5, %v440_v35 }
 0x4df   :  { %v442_v45 = vsub.f32 1.5, %v441_v43 }
 0x4e1   :  { %v443_v47 = vmul.f32 %v672_v32, %v442_v45 }
 0x4e3   :  { %v447_v51 = vsel %vm446_vm11, %v672_v32, %v443_v47 }
 0x4e4   :  { %v448_v52 = vmul.f32 %v447_v51, %v436_v49  ;;  %v599_v51 = vperm.slane %v844_v19, 6 }
 0x4e6   :  { %v450_v54 = vmul.f32 %v449_v50, %v448_v52 }
 0x4e8   :  { %v452_v55 = vadd.f32 %v451_v53, %v450_v54 }
 0x4ea   :  { %v643_v58 = vmul.f32 -1.442695, %v452_v55 }
 0x4ec   :  { %673 = vpow2.f32 %v643_v58 }
 0x4f2   :  { %v674_v59 = vpop.eup %673 }
 0x4f3   :  { %v456_v60 = vadd.f32 1.0, %v674_v59 }
 0x4f5   :  { %675 = vrcp.f32 %v456_v60  ;;  %v468_v0 = vand.u32 2147483648, %v456_v60  ;;  %v466_v2 = vand.u32 2147483647, %v456_v60  ;;  %vm462_vm13 = vweird.f32 %v456_v60 }
 0x4f7   :  { %v469_v4 = vor.u32 1.1754944e-38, %v468_v0  ;;  %vm467_vm15 = vcmp.eq.f32.partialorder %v466_v2, 8.507059e+37 }
 0x4fb   :  { %v676_v61 = vpop.eup %675 }
 0x4fc   :  { %v458_v62 = vmul.f32 %v676_v61, %v456_v60  ;;  %vm463_vm12 = vweird.f32 %v676_v61 }
 0x4fd   :  { %vm464_vm14 = vmor %vm462_vm13, %vm463_vm12 }
 0x4fe   :  { %v459_v63 = vsub.f32 1.0, %v458_v62 }
 0x500   :  { %v460_v1 = vmul.f32 %v676_v61, %v459_v63 }
 0x502   :  { %v461_v3 = vadd.f32 %v676_v61, %v460_v1 }
 0x504   :  { %v465_v5 = vsel %vm464_vm14, %v676_v61, %v461_v3 }
 0x505   :  { %v470_v36 = vsel %vm467_vm15, %v469_v4, %v465_v5 }
 0x506   :  { %v472_v37 = vmul.f32 %v470_v36, %v452_v55 }
 0x508   :  { %644 = vmatmul.msk.f32.vlgmr.msra.gmra.mxu2 %vm150_vm9, %v472_v37 }
 0x58b   :  { %v502_v40 = vpop.f32.mrf.mxu2 }
 0x58c   :  { %v503_v7 = vadd.f32 %v502_v40, %v481_v39 }
 0x58e   :  { %v528_v41 = vmul.f32 %v503_v7, %v503_v7  ;;  %645 = vmatmul.msk.f32.vlgmr.msra.gmra.mxu3 %vm150_vm9, %v503_v7 }
 0x590   :  { %646 = vmatmul.msk.f32.vlgmr.msrb.gmra.mxu1 %vm150_vm9, %v528_v41 }
 0x60d   :  { %v549_v42 = vpop.f32.mrf.mxu1 }
 0x611   :  { %v525_v8 = vpop.f32.mrf.mxu3 }
 0x612   :  { %v552_v9 = vmul.f32 %v525_v8, %v525_v8  ;;  %v554_v21 = vsub.f32 %v503_v7, %v525_v8 }
 0x614   :  { %v553_v10 = vsub.f32 %v549_v42, %v552_v9 }
 0x616   :  { %v555_v56 = vadd.f32 1e-05, %v553_v10 }
 0x618   :  { %677 = vrsqrt.f32 %v555_v56  ;;  %vm562_vm1 = vweird.f32 %v555_v56 }
 0x61e   :  { %v678_v11 = vpop.eup %677 }
 0x61f   :  { %v557_v13 = vmul.f32 %v678_v11, %v555_v56  ;;  %vm563_vm0 = vweird.f32 %v678_v11 }
 0x620   :  { %vm564_vm2 = vmor %vm562_vm1, %vm563_vm0 }
 0x621   :  { %v558_v15 = vmul.f32 %v678_v11, %v557_v13 }
 0x623   :  { %v559_v57 = vmul.f32 0.5, %v558_v15 }
 0x625   :  { %v560_v6 = vsub.f32 1.5, %v559_v57 }
 0x627   :  { %v561_v20 = vmul.f32 %v678_v11, %v560_v6 }
 0x629   :  { %v565_v24 = vsel %vm564_vm2, %v678_v11, %v561_v20 }
 0x62a   :  { %v566_v25 = vmul.f32 %v565_v24, %v554_v21 }
 0x62c   :  { %v568_v28 = vmul.f32 %v567_v22, %v566_v25 }
 0x62e   :  { %v570_v30 = vadd.f32 %v569_v26, %v568_v28 }
 0x630   :  { %v647_v31 = vmul.f32 -1.442695, %v570_v30 }
 0x632   :  { %679 = vpow2.f32 %v647_v31 }
 0x638   :  { %v680_v32 = vpop.eup %679 }
 0x639   :  { %v574_v33 = vadd.f32 1.0, %v680_v32 }
 0x63b   :  { %681 = vrcp.f32 %v574_v33  ;;  %v586_v43 = vand.u32 2147483648, %v574_v33  ;;  %v584_v45 = vand.u32 2147483647, %v574_v33  ;;  %vm580_vm4 = vweird.f32 %v574_v33 }
 0x63d   :  { %v587_v47 = vor.u32 1.1754944e-38, %v586_v43  ;;  %vm585_vm6 = vcmp.eq.f32.partialorder %v584_v45, 8.507059e+37 }
 0x641   :  { %v682_v34 = vpop.eup %681 }
 0x642   :  { %v576_v35 = vmul.f32 %v682_v34, %v574_v33  ;;  %vm581_vm3 = vweird.f32 %v682_v34 }
 0x643   :  { %vm582_vm5 = vmor %vm580_vm4, %vm581_vm3 }
 0x644   :  { %v577_v38 = vsub.f32 1.0, %v576_v35 }
 0x646   :  { %v578_v44 = vmul.f32 %v682_v34, %v577_v38 }
 0x648   :  { %v579_v46 = vadd.f32 %v682_v34, %v578_v44 }
 0x64a   :  { %v583_v48 = vsel %vm582_vm5, %v682_v34, %v579_v46 }
 0x64b   :  { %v588_v49 = vsel %vm585_vm6, %v587_v47, %v583_v48 }
 0x64c   :  { %v590_v50 = vmul.f32 %v588_v49, %v570_v30 }
 0x64e   :  { %648 = vmatmul.msk.f32.vlgmr.msrb.gmra.mxu0 %vm150_vm9, %v590_v50 }
 0x6cb   :  { %v620_v52 = vpop.f32.mrf.mxu0 }
 0x6cc   :  { %v621_v53 = vadd.f32 %v620_v52, %v599_v51 }
 0x6ce   :  { %624 = vst.msk [vmem:[%s865_s3] sm:$0xff] %vm623_vm7, %v621_v53 }
 0x6cf   :  { %629 = vsyncpa [#allocation3], 1 }

</bundles_post_ra>
